<compile_context>
chip_gen: v7x
topology: tpu7x:2x2x1
jax: 0.10.0
libtpu: 0.0.40
codegen_flags: <defaults>
</compile_context>

<pallas_src>
import jax
import jax.numpy as jnp
from jax.experimental import pallas as pl
from jax.experimental.pallas import tpu as pltpu

# Circuit constants (compile-time scalars, as in the module's __init__).
R = 5.0
C = 0.01
L = 0.005
HIDDEN = 50          # DerivNet hidden width
HPAD = 128           # hidden padded to one full lane-width vreg


def _round_up(n, m):
    return ((n + m - 1) // m) * m


def rcl_kernel(x_ref, p_ref, dx_ref):
    """One batch-tile of states.

    x_ref : VMEM (TB, 2)    one state per sublane row
    p_ref : VMEM (8, HPAD)  packed, resident parameters:
              row 0: W1[:, 0]  zero-padded to HPAD lanes
              row 1: W1[:, 1]
              row 2: b1
              row 3: v = w2 * W1[:, 1]
              row 4: [A00, A10, 0...]   with A = F @ diag(1/C, 1/L)
              row 5: [A01, A11, 0...]
              row 6: [0, 1, 0...]
              row 7: [0, -sum(v), 0...]
    dx_ref: VMEM (TB, 2)
    """
    x0 = x_ref[:, 0:1]                      # (TB, 1)
    x1 = x_ref[:, 1:2]                      # (TB, 1)

    # Hidden layer, lane-major: z = x0*W1[:,0] + x1*W1[:,1] + b1 -> (TB, HPAD)
    z = x0 * p_ref[0:1, :] + x1 * p_ref[1:2, :] + p_ref[2:3, :]
    h = jnp.tanh(z)                         # EUP

    # dHa/dx1 = sum_v - sum_k v_k * h_k^2 ; padded lanes have v = 0.
    s = jnp.sum(p_ref[3:4, :] * (h * h), axis=1, keepdims=True)   # (TB, 1)

    # dx = A @ [x0, x1]^T + [0, s - sum_v]  per row; single full-tile store.
    dx_ref[...] = (x0 * p_ref[4:5, 0:2] + x1 * p_ref[5:6, 0:2]
                   + s * p_ref[6:7, 0:2] + p_ref[7:8, 0:2])


def _pack_params(params):
    """Fold constants and pack every resident parameter into one (8, HPAD)."""
    w1, b1, w2, b2, f = params
    del b2                                   # drops out of dHa/dx (and dx)
    w1 = jnp.asarray(w1, jnp.float32).reshape(HIDDEN, 2)
    b1 = jnp.asarray(b1, jnp.float32).reshape(HIDDEN)
    w2 = jnp.asarray(w2, jnp.float32).reshape(HIDDEN)
    f = jnp.asarray(f, jnp.float32).reshape(2, 2)

    v = w2 * w1[:, 1]                                          # (H,)
    sum_v = jnp.sum(v)
    a = f * jnp.array([[1.0 / C, 1.0 / L]], jnp.float32)       # A[i,j]=F[i,j]*[1/C,1/L][j]

    p = jnp.zeros((8, HPAD), jnp.float32)
    p = p.at[0, :HIDDEN].set(w1[:, 0])
    p = p.at[1, :HIDDEN].set(w1[:, 1])
    p = p.at[2, :HIDDEN].set(b1)
    p = p.at[3, :HIDDEN].set(v)
    p = p.at[4, 0:2].set(a[:, 0])            # [A00, A10]
    p = p.at[5, 0:2].set(a[:, 1])            # [A01, A11]
    p = p.at[6, 1].set(1.0)
    p = p.at[7, 1].set(-sum_v)
    return p


def rcl_forward_batch(x_batch, params, *, block_b=1024):
    """dx for a batch of independent states.  x_batch: (B, 2) -> (B, 2)."""
    xb = jnp.asarray(x_batch, jnp.float32).reshape(-1, 2)
    B = xb.shape[0]
    packed = _pack_params(params)

    b8 = _round_up(B, 8)
    tb = min(_round_up(block_b, 8), b8)      # sublane-aligned batch tile
    # Keep >= 2 grid steps when possible so the "parallel" batch axis can be
    # sharded across both TensorCores on v7x (harmless on v5e/v6e).
    if tb == b8 and tb >= 16:
        tb = _round_up((b8 + 1) // 2, 8)
    bp = _round_up(B, tb)
    if bp != B:
        xb = jnp.pad(xb, ((0, bp - B), (0, 0)))

    out = pl.pallas_call(
        rcl_kernel,
        out_shape=jax.ShapeDtypeStruct((bp, 2), jnp.float32),
        grid_spec=pltpu.PrefetchScalarGridSpec(
            num_scalar_prefetch=0,
            grid=(bp // tb,),
            in_specs=[
                pl.BlockSpec((tb, 2), lambda i: (i, 0)),     # x tile
                pl.BlockSpec((8, HPAD), lambda i: (0, 0)),   # packed params, resident
            ],
            out_specs=pl.BlockSpec((tb, 2), lambda i: (i, 0)),
        ),
        compiler_params=pltpu.CompilerParams(
            dimension_semantics=("parallel",)),
    )(xb, packed)
    return out[:B]


def rcl_forward(t, x, params):
    """Pallas-backed forward of RCLcircuit: x is a (2, 1) column vector."""
    del t  # unused by the dynamics, exactly as in the PyTorch module
    # TODO(synk): for ODE-integrator use, batch solver stages / trajectories
    # through rcl_forward_batch instead of one pallas_call per (2, 1) state.
    dx = rcl_forward_batch(jnp.reshape(x, (1, 2)), params)
    return dx.reshape(2, 1)


def rcl_forward_ref(t, x, params):
    """Pure-JAX reference for correctness checking (column-vector form)."""
    del t
    w1, b1, w2, b2, f = params
    z = w1 @ x + b1
    h = jnp.tanh(z)
    dHadx = w1.T @ (w2.T * (1.0 - h * h))
    dHdx = x * jnp.array([[1.0 / C], [1.0 / L]], jnp.float32)
    u = jnp.array([[0.0], [1.0]], jnp.float32) * (-dHadx)
    return f @ dHdx + u


def init_params(key):
    """Deterministic init mimicking nn.Linear's default U(-1/sqrt(fan_in), .)."""
    k1, k2, k3, k4 = jax.random.split(key, 4)
    lim1 = 1.0 / jnp.sqrt(2.0)
    lim2 = 1.0 / jnp.sqrt(float(HIDDEN))
    w1 = jax.random.uniform(k1, (HIDDEN, 2), jnp.float32, -lim1, lim1)
    b1 = jax.random.uniform(k2, (HIDDEN, 1), jnp.float32, -lim1, lim1)
    w2 = jax.random.uniform(k3, (1, HIDDEN), jnp.float32, -lim2, lim2)
    b2 = jax.random.uniform(k4, (1, 1), jnp.float32, -lim2, lim2)
    f = jnp.array([[-1.0 / R, 1.0], [-1.0, 0.0]], jnp.float32)
    return (w1, b1, w2, b2, f)


if __name__ == "__main__":
    key = jax.random.PRNGKey(0)
    kp, kx, kb = jax.random.split(key, 3)
    params = init_params(kp)
    t = jnp.float32(0.0)

    # 1) Module-faithful single-state forward: x is a (2, 1) column vector.
    x = jax.random.normal(kx, (2, 1), jnp.float32)
    dx = jax.block_until_ready(rcl_forward(t, x, params))
    dx_ref = rcl_forward_ref(t, x, params)
    assert dx.shape == (2, 1)
    assert jnp.allclose(dx, dx_ref, atol=1e-4, rtol=1e-5), (dx, dx_ref)

    # 2) Batched forward (amortizes launch/DMA overhead; exercises the grid,
    #    including the >=2-step split for v7x megacore sharding).
    B = 256
    xb = jax.random.normal(kb, (B, 2), jnp.float32)
    dxb = jax.block_until_ready(rcl_forward_batch(xb, params))
    dxb_ref = jax.vmap(
        lambda xi: rcl_forward_ref(t, xi.reshape(2, 1), params).reshape(2))(xb)
    assert dxb.shape == (B, 2)
    assert jnp.allclose(dxb, dxb_ref, atol=1e-4, rtol=1e-5)

    print("KERNEL_OK")
</pallas_src>

<mosaic_0001>
module attributes {stable_mosaic.version = 11 : i64} {
  func.func @rcl_kernel(%arg0: i32, %arg1: memref<8x2xf32, #tpu.memory_space<vmem>>, %arg2: memref<8x128xf32, #tpu.memory_space<vmem>>, %arg3: memref<8x2xf32, #tpu.memory_space<vmem>>) attributes {dimension_semantics = [#tpu.dimension_semantics<parallel>], iteration_bounds = array<i64: 1>, scalar_prefetch = 0 : i64, scratch_operands = 0 : i64, tpu.core_type = #tpu.core_type<tc>, window_params = [{transform_indices = @transform_0, window_bounds = array<i64: 8, 2>}, {pipeline_mode = #tpu.pipeline_mode<synchronous>, transform_indices = @transform_1, window_bounds = array<i64: 8, 128>}, {transform_indices = @transform_2, window_bounds = array<i64: 8, 2>}]} {
    %c0 = arith.constant 0 : index
    %c0_0 = arith.constant 0 : index
    %0 = vector.load %arg1[%c0, %c0_0] : memref<8x2xf32, #tpu.memory_space<vmem>>, vector<8x1xf32>
    %c0_1 = arith.constant 0 : index
    %c1 = arith.constant 1 : index
    %1 = vector.load %arg1[%c0_1, %c1] : memref<8x2xf32, #tpu.memory_space<vmem>>, vector<8x1xf32>
    %c0_2 = arith.constant 0 : index
    %c0_3 = arith.constant 0 : index
    %2 = vector.load %arg2[%c0_2, %c0_3] : memref<8x128xf32, #tpu.memory_space<vmem>>, vector<1x128xf32>
    %3 = vector.broadcast %0 : vector<8x1xf32> to vector<8x128xf32>
    %4 = vector.broadcast %2 : vector<1x128xf32> to vector<8x128xf32>
    %5 = arith.mulf %3, %4 : vector<8x128xf32>
    %c1_4 = arith.constant 1 : index
    %c0_5 = arith.constant 0 : index
    %6 = vector.load %arg2[%c1_4, %c0_5] : memref<8x128xf32, #tpu.memory_space<vmem>>, vector<1x128xf32>
    %7 = vector.broadcast %1 : vector<8x1xf32> to vector<8x128xf32>
    %8 = vector.broadcast %6 : vector<1x128xf32> to vector<8x128xf32>
    %9 = arith.mulf %7, %8 : vector<8x128xf32>
    %10 = arith.addf %5, %9 : vector<8x128xf32>
    %c2 = arith.constant 2 : index
    %c0_6 = arith.constant 0 : index
    %11 = vector.load %arg2[%c2, %c0_6] : memref<8x128xf32, #tpu.memory_space<vmem>>, vector<1x128xf32>
    %12 = vector.broadcast %11 : vector<1x128xf32> to vector<8x128xf32>
    %13 = arith.addf %10, %12 : vector<8x128xf32>
    %14 = math.tanh %13 : vector<8x128xf32>
    %c3 = arith.constant 3 : index
    %c0_7 = arith.constant 0 : index
    %15 = vector.load %arg2[%c3, %c0_7] : memref<8x128xf32, #tpu.memory_space<vmem>>, vector<1x128xf32>
    %16 = arith.mulf %14, %14 : vector<8x128xf32>
    %17 = vector.broadcast %15 : vector<1x128xf32> to vector<8x128xf32>
    %18 = arith.mulf %17, %16 : vector<8x128xf32>
    %cst = arith.constant dense<0.000000e+00> : vector<8xf32>
    %19 = vector.multi_reduction <add>, %18, %cst [1] : vector<8x128xf32> to vector<8xf32>
    %20 = vector.shape_cast %19 : vector<8xf32> to vector<8x1xf32>
    %c4 = arith.constant 4 : index
    %c0_8 = arith.constant 0 : index
    %21 = vector.load %arg2[%c4, %c0_8] : memref<8x128xf32, #tpu.memory_space<vmem>>, vector<1x2xf32>
    %22 = vector.broadcast %0 : vector<8x1xf32> to vector<8x2xf32>
    %23 = vector.broadcast %21 : vector<1x2xf32> to vector<8x2xf32>
    %24 = arith.mulf %22, %23 : vector<8x2xf32>
    %c5 = arith.constant 5 : index
    %c0_9 = arith.constant 0 : index
    %25 = vector.load %arg2[%c5, %c0_9] : memref<8x128xf32, #tpu.memory_space<vmem>>, vector<1x2xf32>
    %26 = vector.broadcast %1 : vector<8x1xf32> to vector<8x2xf32>
    %27 = vector.broadcast %25 : vector<1x2xf32> to vector<8x2xf32>
    %28 = arith.mulf %26, %27 : vector<8x2xf32>
    %29 = arith.addf %24, %28 : vector<8x2xf32>
    %c6 = arith.constant 6 : index
    %c0_10 = arith.constant 0 : index
    %30 = vector.load %arg2[%c6, %c0_10] : memref<8x128xf32, #tpu.memory_space<vmem>>, vector<1x2xf32>
    %31 = vector.broadcast %20 : vector<8x1xf32> to vector<8x2xf32>
    %32 = vector.broadcast %30 : vector<1x2xf32> to vector<8x2xf32>
    %33 = arith.mulf %31, %32 : vector<8x2xf32>
    %34 = arith.addf %29, %33 : vector<8x2xf32>
    %c7 = arith.constant 7 : index
    %c0_11 = arith.constant 0 : index
    %35 = vector.load %arg2[%c7, %c0_11] : memref<8x128xf32, #tpu.memory_space<vmem>>, vector<1x2xf32>
    %36 = vector.broadcast %35 : vector<1x2xf32> to vector<8x2xf32>
    %37 = arith.addf %34, %36 : vector<8x2xf32>
    %c0_12 = arith.constant 0 : index
    %c0_13 = arith.constant 0 : index
    %38 = vector.load %arg3[%c0_12, %c0_13] : memref<8x2xf32, #tpu.memory_space<vmem>>, vector<8x2xf32>
    tpu.vector_store %arg3[%c0_12, %c0_13], %37 {strides = array<i32>} : memref<8x2xf32, #tpu.memory_space<vmem>>, vector<8x2xf32>,
    return
  }
  func.func @transform_0(%arg0: i32) -> (i32, i32) {
    %c0_i32 = arith.constant 0 : i32
    %c0_i32_0 = arith.constant 0 : i32
    return %arg0, %c0_i32 : i32, i32
  }
  func.func @transform_1(%arg0: i32) -> (i32, i32) {
    %c0_i32 = arith.constant 0 : i32
    %c0_i32_0 = arith.constant 0 : i32
    %c0_i32_1 = arith.constant 0 : i32
    return %c0_i32, %c0_i32_0 : i32, i32
  }
  func.func @transform_2(%arg0: i32) -> (i32, i32) {
    %c0_i32 = arith.constant 0 : i32
    %c0_i32_0 = arith.constant 0 : i32
    return %arg0, %c0_i32 : i32, i32
  }
}

</mosaic_0001>

<bundles_post_ra>
// kernel: tpu_custom_call.1
= control target key start
LH: loop header
LB: loop body
LE: loop exit
PB: predicated region body
PF: predicated region fallthrough
CT: control target
= control target key end

     0   :  { %v96_v0 = vmov 0   ;;  %v97_v2 = vmov 1   ;;  %vm76_vm0 = vcmask 15360   ;;  %s143_s0 = inlined_call_operand.vmem [shape: f32[8,2], index: 0, kind: input, shape index: {}]   ;;  %s144_s1 = inlined_call_operand.vmem [shape: f32[8,128], index: 1, kind: input, shape index: {}]   ;;  %s145_s2 = inlined_call_operand.vmem [shape: f32[8,2], index: 2, kind: output, shape index: {}]  }
   0x1   :  { %92 = vset.pattern.permute.xlu0 %v96_v0  ;;  %v11_v1 = vld [vmem:[%s143_s0] sm:$0xff] }
   0x2   :  { %15 = vperm.xlu0 %92, %v11_v1   ;;  %v86_v3 = vld [vmem:[%s144_s1 + $0x4] ss:$0 sm:$0xff]  ;;  %v82_v6 = vld [vmem:[%s144_s1] ss:$0 sm:$0xff]  ;;  %v83_v7 = vld [vmem:[%s144_s1 + $0x1] ss:$0 sm:$0xff] }
   0x3   :  { %v87_v8 = vld [vmem:[%s144_s1 + $0x5] ss:$0 sm:$0xff]  ;;  %v84_v13 = vld [vmem:[%s144_s1 + $0x2] ss:$0 sm:$0xff]  ;;  %v85_v18 = vld [vmem:[%s144_s1 + $0x3] ss:$0 sm:$0xff] }
   0x4   :  { %v88_v21 = vld [vmem:[%s144_s1 + $0x6] ss:$0 sm:$0xff]  ;;  %v89_v24 = vld [vmem:[%s144_s1 + $0x7] ss:$0 sm:$0xff] }
   0x6   :  { %93 = vset.pattern.permute.xlu0 %v97_v2 }
   0x7   :  { %25 = vperm.xlu0 %93, %v11_v1  }
  0x81   :  { %v16_v4 = vpop.permute.xlu0 %15 }
  0x82   :  { %v55_v5 = vmul.f32 %v86_v3, %v16_v4  ;;  %v22_v10 = vmul.f32 %v82_v6, %v16_v4 }
  0x86   :  { %v26_v9 = vpop.permute.xlu0 %25 }
  0x87   :  { %v32_v11 = vmul.f32 %v83_v7, %v26_v9  ;;  %v61_v12 = vmul.f32 %v87_v8, %v26_v9 }
  0x89   :  { %v33_v14 = vadd.f32 %v32_v11, %v22_v10  ;;  %v62_v15 = vadd.f32 %v61_v12, %v55_v5 }
  0x8b   :  { %v39_v16 = vadd.f32 %v84_v13, %v33_v14 }
  0x8d   :  { %94 = vtanh.f32 %v39_v16 }
  0x97   :  { %v95_v17 = vpop.eup %94 }
  0x98   :  { %v42_v19 = vmul.f32 %v95_v17, %v95_v17 }
  0x9a   :  { %v47_v20 = vmul.f32 %v85_v18, %v42_v19 }
  0x9c   :  { %48 = vadd.xlane.f32.xlu1 %v47_v20 }
 0x129   :  { %v49_v22 = vpop.xlane.xlu1 %48 }
 0x12a   :  { %v68_v23 = vmul.f32 %v88_v21, %v49_v22 }
 0x12c   :  { %v69_v25 = vadd.f32 %v68_v23, %v62_v15 }
 0x12e   :  { %v75_v26 = vadd.f32 %v89_v24, %v69_v25 }
 0x130   :  { %77 = vst.msk [vmem:[%s145_s2] sm:$0xff] %vm76_vm0, %v75_v26 }

</bundles_post_ra>
